<compile_context>
chip_gen: v7x
topology: tpu7x:2x2x1
jax: 0.10.0
libtpu: 0.0.40
codegen_flags: <defaults>
</compile_context>

<pallas_src>
import functools

import jax
import jax.numpy as jnp
from jax.experimental import pallas as pl
from jax.experimental.pallas import tpu as pltpu


def _round_up(x, m):
    return ((x + m - 1) // m) * m


def _critic_kernel(x_ref, w1_ref, b1_ref, w2_ref, b2_ref, w3t_ref, b3t_ref, o_ref):
    # Fused 3-layer MLP: bf16 MXU inputs, f32 accumulation, f32 bias/ReLU.
    x = x_ref[...].astype(jnp.bfloat16)                                  # [TB, D]
    h1 = jnp.dot(x, w1_ref[...], preferred_element_type=jnp.float32) + b1_ref[...]
    h1 = jnp.maximum(h1, 0.0).astype(jnp.bfloat16)                       # [TB, 64]
    h2 = jnp.dot(h1, w2_ref[...], preferred_element_type=jnp.float32) + b2_ref[...]
    h2 = jnp.maximum(h2, 0.0).astype(jnp.bfloat16)                       # [TB, 32]
    # Final layer in transposed form so the batch dim lands on lanes:
    #   outT[p, b] = sum_k w3t[p, k] * h2[b, k]   (row 0 is the real output,
    #   rows 1..7 are the zero-padded sublanes -> one dense (8, TB) vst block).
    out_t = jax.lax.dot_general(
        w3t_ref[...], h2,
        dimension_numbers=(((1,), (1,)), ((), ())),
        preferred_element_type=jnp.float32)                              # [8, TB]
    o_ref[...] = (out_t + b3t_ref[...]).astype(o_ref.dtype)


def prepare_critic_params(params):
    """One-time (per parameter update) preparation of kernel operands.

    Keeps the zero-padding invariant for w3t/b3t: rows 1..7 of both are zero,
    so only output row 0 carries the real Linear(32, 1) result.
    """
    h2 = params["w3"].shape[0]
    w3t = jnp.zeros((8, h2), jnp.bfloat16).at[0, :].set(
        params["w3"].reshape(h2).astype(jnp.bfloat16))                   # [8, 32]
    b3t = jnp.zeros((8, 1), jnp.float32).at[0, 0].set(
        params["b3"].reshape(()).astype(jnp.float32))                    # [8, 1]
    return {
        "w1": params["w1"].astype(jnp.bfloat16),                         # [D, 64]
        "b1": params["b1"].astype(jnp.float32).reshape(1, -1),           # [1, 64]
        "w2": params["w2"].astype(jnp.bfloat16),                         # [64, 32]
        "b2": params["b2"].astype(jnp.float32).reshape(1, -1),           # [1, 32]
        "w3t": w3t,
        "b3t": b3t,
    }


def critic_forward(x, prep, *, tile_b=2048):
    """x: [B, state_dim] float32.  prep: output of prepare_critic_params."""
    B, state_dim = x.shape

    # Batch padding only when B is not already a multiple of 128 (lane-dense
    # output tiles need a 128-multiple lane extent).  Aligned batches pay no pad.
    B_pad = _round_up(B, 128)
    if B_pad != B:
        x = jnp.pad(x, ((0, B_pad - B), (0, 0)))

    # Batch tile: multiple of 128, as large as possible (amortize per-step cost),
    # but keep >= 2 grid steps when there is enough work so both v7x TensorCores
    # get batch tiles (no-op on single-TC v5e/v6e).
    tb = min(_round_up(max(tile_b, 128), 128), B_pad)
    if B_pad // tb < 2 and B_pad >= 256:
        tb = _round_up(B_pad // 2, 128)
    grid = (pl.cdiv(B_pad, tb),)

    x_spec = pl.BlockSpec((tb, state_dim), lambda i: (i, 0))
    out_spec = pl.BlockSpec((8, tb), lambda i: (0, i))
    # Weights/biases: full-shape blocks, same block index every step -> VMEM-resident.
    full = lambda a: pl.BlockSpec(a.shape, lambda i: (0, 0))

    out = pl.pallas_call(
        _critic_kernel,
        out_shape=jax.ShapeDtypeStruct((8, B_pad), jnp.float32),
        grid=grid,
        in_specs=[x_spec, full(prep["w1"]), full(prep["b1"]),
                  full(prep["w2"]), full(prep["b2"]),
                  full(prep["w3t"]), full(prep["b3t"])],
        out_specs=out_spec,
        compiler_params=pltpu.CompilerParams(
            dimension_semantics=("parallel",),   # v7x: shard batch tiles across both TCs
        ),
    )(x, prep["w1"], prep["b1"], prep["w2"], prep["b2"], prep["w3t"], prep["b3t"])

    # Row 0 of the (8, B_pad) slab is the Linear(32, 1) output; tiny slice/reshape.
    return out[0, :B].reshape(B, 1)


def init_critic_params(key, state_dim):
    """PyTorch nn.Linear default init: U[-1/sqrt(fan_in), +1/sqrt(fan_in)]."""
    dims = [(state_dim, 64), (64, 32), (32, 1)]
    params = {}
    for i, (fan_in, fan_out) in enumerate(dims, start=1):
        key, kw, kb = jax.random.split(key, 3)
        bound = 1.0 / jnp.sqrt(jnp.float32(fan_in))
        params[f"w{i}"] = jax.random.uniform(
            kw, (fan_in, fan_out), jnp.float32, -bound, bound)
        params[f"b{i}"] = jax.random.uniform(
            kb, (1, fan_out), jnp.float32, -bound, bound)
    return params


def _ref_forward_f32(x, params):
    """Exact f32 reference matching the PyTorch Critic."""
    h1 = jnp.maximum(x @ params["w1"] + params["b1"], 0.0)
    h2 = jnp.maximum(h1 @ params["w2"] + params["b2"], 0.0)
    return h2 @ params["w3"] + params["b3"]


def _ref_forward_bf16(x, params):
    """Reference matching the kernel's bf16-input / f32-accumulate math."""
    dot = functools.partial(jnp.dot, preferred_element_type=jnp.float32)
    h1 = dot(x.astype(jnp.bfloat16), params["w1"].astype(jnp.bfloat16)) + params["b1"]
    h1 = jnp.maximum(h1, 0.0).astype(jnp.bfloat16)
    h2 = dot(h1, params["w2"].astype(jnp.bfloat16)) + params["b2"]
    h2 = jnp.maximum(h2, 0.0).astype(jnp.bfloat16)
    return dot(h2, params["w3"].astype(jnp.bfloat16)) + params["b3"]


def _check(out, x, params, name):
    ref_bf = _ref_forward_bf16(x, params)
    ref_f32 = _ref_forward_f32(x, params)
    assert out.shape == (x.shape[0], 1), f"{name}: bad shape {out.shape}"
    assert jnp.allclose(out, ref_bf, atol=1e-4, rtol=1e-4), (
        f"{name}: vs bf16 ref, max abs err {jnp.max(jnp.abs(out - ref_bf))}")
    # bf16 MXU inputs deviate from the true f32 module by O(1e-2); check loosely.
    assert jnp.allclose(out, ref_f32, atol=5e-2, rtol=5e-2), (
        f"{name}: vs f32 ref, max abs err {jnp.max(jnp.abs(out - ref_f32))}")


if __name__ == "__main__":
    key = jax.random.PRNGKey(0)
    k_x, k_p = jax.random.split(key)

    batch = 8
    state_dim = 32

    params = init_critic_params(k_p, state_dim)
    prep = prepare_critic_params(params)          # hoisted out of the per-call path

    fwd = jax.jit(critic_forward, static_argnames=("tile_b",))

    # Small inference-style batch (single 128-row tile after padding).
    x = jax.random.normal(k_x, (batch, state_dim), dtype=jnp.float32)
    out = jax.block_until_ready(fwd(x, prep))
    _check(out, x, params, "small")

    # Large, 128-aligned batch: no pad, TB=2048, grid=2 (dual-TC path on v7x).
    xb = jax.random.normal(k_x, (4096, state_dim), dtype=jnp.float32)
    outb = jax.block_until_ready(fwd(xb, prep))
    _check(outb, xb, params, "large")

    # Non-128-multiple batch: exercises the pad + row-0 slice path.
    xc = jax.random.normal(k_x, (1000, state_dim), dtype=jnp.float32)
    outc = jax.block_until_ready(fwd(xc, prep))
    _check(outc, xc, params, "ragged")

    print("KERNEL_OK")
</pallas_src>

<mosaic_0001>
module attributes {stable_mosaic.version = 11 : i64} {
  func.func @_critic_kernel(%arg0: i32, %arg1: memref<128x32xf32, #tpu.memory_space<vmem>>, %arg2: memref<32x64xbf16, #tpu.memory_space<vmem>>, %arg3: memref<1x64xf32, #tpu.memory_space<vmem>>, %arg4: memref<64x32xbf16, #tpu.memory_space<vmem>>, %arg5: memref<1x32xf32, #tpu.memory_space<vmem>>, %arg6: memref<8x32xbf16, #tpu.memory_space<vmem>>, %arg7: memref<8x1xf32, #tpu.memory_space<vmem>>, %arg8: memref<8x128xf32, #tpu.memory_space<vmem>>) attributes {dimension_semantics = [#tpu.dimension_semantics<parallel>], iteration_bounds = array<i64: 1>, scalar_prefetch = 0 : i64, scratch_operands = 0 : i64, tpu.core_type = #tpu.core_type<tc>, window_params = [{transform_indices = @transform_0, window_bounds = array<i64: 128, 32>}, {pipeline_mode = #tpu.pipeline_mode<synchronous>, transform_indices = @transform_1, window_bounds = array<i64: 32, 64>}, {pipeline_mode = #tpu.pipeline_mode<synchronous>, transform_indices = @transform_2, window_bounds = array<i64: 1, 64>}, {pipeline_mode = #tpu.pipeline_mode<synchronous>, transform_indices = @transform_3, window_bounds = array<i64: 64, 32>}, {pipeline_mode = #tpu.pipeline_mode<synchronous>, transform_indices = @transform_4, window_bounds = array<i64: 1, 32>}, {pipeline_mode = #tpu.pipeline_mode<synchronous>, transform_indices = @transform_5, window_bounds = array<i64: 8, 32>}, {pipeline_mode = #tpu.pipeline_mode<synchronous>, transform_indices = @transform_6, window_bounds = array<i64: 8, 1>}, {transform_indices = @transform_7, window_bounds = array<i64: 8, 128>}]} {
    %c0 = arith.constant 0 : index
    %c0_0 = arith.constant 0 : index
    %0 = vector.load %arg1[%c0, %c0_0] : memref<128x32xf32, #tpu.memory_space<vmem>>, vector<128x32xf32>
    %1 = arith.truncf %0 : vector<128x32xf32> to vector<128x32xbf16>
    %c0_1 = arith.constant 0 : index
    %c0_2 = arith.constant 0 : index
    %2 = vector.load %arg2[%c0_1, %c0_2] : memref<32x64xbf16, #tpu.memory_space<vmem>>, vector<32x64xbf16>
    %cst = arith.constant dense<0.000000e+00> : vector<128x64xf32>
    %3 = tpu.matmul %1, %2, %cst {dimension_numbers = #tpu.dot_dimension_numbers<[1], [0], [0], [1], [0, 0, 1, 1], [], []>} : vector<128x32xbf16>, vector<32x64xbf16>, vector<128x64xf32> -> vector<128x64xf32>
    %c0_3 = arith.constant 0 : index
    %c0_4 = arith.constant 0 : index
    %4 = vector.load %arg3[%c0_3, %c0_4] : memref<1x64xf32, #tpu.memory_space<vmem>>, vector<1x64xf32>
    %5 = vector.broadcast %4 : vector<1x64xf32> to vector<128x64xf32>
    %6 = arith.addf %3, %5 : vector<128x64xf32>
    %cst_5 = arith.constant 0.000000e+00 : f32
    %7 = vector.broadcast %cst_5 : f32 to vector<128x64xf32>
    %8 = arith.maximumf %6, %7 : vector<128x64xf32>
    %9 = arith.truncf %8 : vector<128x64xf32> to vector<128x64xbf16>
    %c0_6 = arith.constant 0 : index
    %c0_7 = arith.constant 0 : index
    %10 = vector.load %arg4[%c0_6, %c0_7] : memref<64x32xbf16, #tpu.memory_space<vmem>>, vector<64x32xbf16>
    %cst_8 = arith.constant dense<0.000000e+00> : vector<128x32xf32>
    %11 = tpu.matmul %9, %10, %cst_8 {dimension_numbers = #tpu.dot_dimension_numbers<[1], [0], [0], [1], [0, 0, 1, 1], [], []>} : vector<128x64xbf16>, vector<64x32xbf16>, vector<128x32xf32> -> vector<128x32xf32>
    %c0_9 = arith.constant 0 : index
    %c0_10 = arith.constant 0 : index
    %12 = vector.load %arg5[%c0_9, %c0_10] : memref<1x32xf32, #tpu.memory_space<vmem>>, vector<1x32xf32>
    %13 = vector.broadcast %12 : vector<1x32xf32> to vector<128x32xf32>
    %14 = arith.addf %11, %13 : vector<128x32xf32>
    %cst_11 = arith.constant 0.000000e+00 : f32
    %15 = vector.broadcast %cst_11 : f32 to vector<128x32xf32>
    %16 = arith.maximumf %14, %15 : vector<128x32xf32>
    %17 = arith.truncf %16 : vector<128x32xf32> to vector<128x32xbf16>
    %c0_12 = arith.constant 0 : index
    %c0_13 = arith.constant 0 : index
    %18 = vector.load %arg6[%c0_12, %c0_13] : memref<8x32xbf16, #tpu.memory_space<vmem>>, vector<8x32xbf16>
    %cst_14 = arith.constant dense<0.000000e+00> : vector<8x128xf32>
    %19 = tpu.matmul %18, %17, %cst_14 {dimension_numbers = #tpu.dot_dimension_numbers<[1], [1], [0], [0], [0, 0, 1, 0], [], []>} : vector<8x32xbf16>, vector<128x32xbf16>, vector<8x128xf32> -> vector<8x128xf32>
    %c0_15 = arith.constant 0 : index
    %c0_16 = arith.constant 0 : index
    %20 = vector.load %arg7[%c0_15, %c0_16] : memref<8x1xf32, #tpu.memory_space<vmem>>, vector<8x1xf32>
    %21 = vector.broadcast %20 : vector<8x1xf32> to vector<8x128xf32>
    %22 = arith.addf %19, %21 : vector<8x128xf32>
    %c0_17 = arith.constant 0 : index
    %c0_18 = arith.constant 0 : index
    %23 = vector.load %arg8[%c0_17, %c0_18] : memref<8x128xf32, #tpu.memory_space<vmem>>, vector<8x128xf32>
    tpu.vector_store %arg8[%c0_17, %c0_18], %22 {strides = array<i32>} : memref<8x128xf32, #tpu.memory_space<vmem>>, vector<8x128xf32>,
    return
  }
  func.func @transform_0(%arg0: i32) -> (i32, i32) {
    %c0_i32 = arith.constant 0 : i32
    %c0_i32_0 = arith.constant 0 : i32
    return %arg0, %c0_i32 : i32, i32
  }
  func.func @transform_1(%arg0: i32) -> (i32, i32) {
    %c0_i32 = arith.constant 0 : i32
    %c0_i32_0 = arith.constant 0 : i32
    %c0_i32_1 = arith.constant 0 : i32
    return %c0_i32, %c0_i32_0 : i32, i32
  }
  func.func @transform_2(%arg0: i32) -> (i32, i32) {
    %c0_i32 = arith.constant 0 : i32
    %c0_i32_0 = arith.constant 0 : i32
    %c0_i32_1 = arith.constant 0 : i32
    return %c0_i32, %c0_i32_0 : i32, i32
  }
  func.func @transform_3(%arg0: i32) -> (i32, i32) {
    %c0_i32 = arith.constant 0 : i32
    %c0_i32_0 = arith.constant 0 : i32
    %c0_i32_1 = arith.constant 0 : i32
    return %c0_i32, %c0_i32_0 : i32, i32
  }
  func.func @transform_4(%arg0: i32) -> (i32, i32) {
    %c0_i32 = arith.constant 0 : i32
    %c0_i32_0 = arith.constant 0 : i32
    %c0_i32_1 = arith.constant 0 : i32
    return %c0_i32, %c0_i32_0 : i32, i32
  }
  func.func @transform_5(%arg0: i32) -> (i32, i32) {
    %c0_i32 = arith.constant 0 : i32
    %c0_i32_0 = arith.constant 0 : i32
    %c0_i32_1 = arith.constant 0 : i32
    return %c0_i32, %c0_i32_0 : i32, i32
  }
  func.func @transform_6(%arg0: i32) -> (i32, i32) {
    %c0_i32 = arith.constant 0 : i32
    %c0_i32_0 = arith.constant 0 : i32
    %c0_i32_1 = arith.constant 0 : i32
    return %c0_i32, %c0_i32_0 : i32, i32
  }
  func.func @transform_7(%arg0: i32) -> (i32, i32) {
    %c0_i32 = arith.constant 0 : i32
    %c0_i32_0 = arith.constant 0 : i32
    return %c0_i32, %arg0 : i32, i32
  }
}

</mosaic_0001>

<bundles_post_ra>
// kernel: critic_forward.1
= control target key start
LH: loop header
LB: loop body
LE: loop exit
PB: predicated region body
PF: predicated region fallthrough
CT: control target
= control target key end

     0   :  { %vm74_vm0 = vcmask 261120   ;;  %vm259_vm1 = vcmask 523264   ;;  %vm615_vm2 = vmmov 0   ;;  %s772_s1 = inlined_call_operand.vmem [shape: bf16[32,64], index: 1, kind: input, shape index: {}]   ;;  %s773_s0 = inlined_call_operand.vmem [shape: f32[128,32], index: 0, kind: input, shape index: {}]   ;;  %s774_s3 = inlined_call_operand.vmem [shape: bf16[64,32], index: 3, kind: input, shape index: {}]   ;;  %s775_s2 = inlined_call_operand.vmem [shape: f32[1,64], index: 2, kind: input, shape index: {}]   ;;  %s776_s6 = inlined_call_operand.vmem [shape: f32[8,1], index: 6, kind: input, shape index: {}]   ;;  %s777_s4 = inlined_call_operand.vmem [shape: f32[1,32], index: 4, kind: input, shape index: {}]   ;;  %s778_s5 = inlined_call_operand.vmem [shape: bf16[8,32], index: 5, kind: input, shape index: {}]   ;;  %s779_s7 = inlined_call_operand.vmem [shape: f32[8,128], index: 7, kind: output, shape index: {}]  }
   0x1   :  { %v608_v0 = vld [vmem:[%s772_s1] sm:$0xff]   ;;  %v609_v1 = vld [vmem:[%s772_s1 + $0x8] sm:$0xff]   ;;  %v29_v5 = vld [vmem:[%s773_s0 + $0x10] sm:$0xff] }
   0x2   :  { %540 = vmatprep.subr.bf16.mxu1 %v608_v0  ;;  %v27_v2 = vld [vmem:[%s773_s0] sm:$0xff]  ;;  %v28_v3 = vld [vmem:[%s773_s0 + $0x8] sm:$0xff]  ;;  %v30_v6 = vld [vmem:[%s773_s0 + $0x18] sm:$0xff] }
   0x3   :  { %541 = vmatpush3.bf16.msra.mxu1 %v608_v0  ;;  %v43_v4 = vpack.c.bf16 %v28_v3, %v27_v2  ;;  %v31_v7 = vld [vmem:[%s773_s0 + $0x20] sm:$0xff]  ;;  %v32_v8 = vld [vmem:[%s773_s0 + $0x28] sm:$0xff]  ;;  %v44_v9 = vpack.c.bf16 %v30_v6, %v29_v5  ;;  %v33_v13 = vld [vmem:[%s773_s0 + $0x30] sm:$0xff] }
   0x4   :  { %542 = vmatprep.subr.bf16.mxu1 %v609_v1  ;;  %v45_v10 = vpack.c.bf16 %v32_v8, %v31_v7  ;;  %v610_v11 = vld [vmem:[%s774_s3] sm:$0xff]   ;;  %v611_v12 = vld [vmem:[%s774_s3 + $0x8] sm:$0xff]   ;;  %v34_v14 = vld [vmem:[%s773_s0 + $0x38] sm:$0xff] }
   0x5   :  { %544 = vmatprep.mubr.msk.bf16.mxu1 %vm74_vm0, %v43_v4  ;;  %v35_v15 = vld [vmem:[%s773_s0 + $0x40] sm:$0xff]  ;;  %v36_v16 = vld [vmem:[%s773_s0 + $0x48] sm:$0xff]  ;;  %v612_v17 = vld [vmem:[%s774_s3 + $0x10] sm:$0xff]   ;;  %v46_v18 = vpack.c.bf16 %v34_v14, %v33_v13 }
   0x6   :  { %v47_v19 = vpack.c.bf16 %v36_v16, %v35_v15  ;;  %v37_v20 = vld [vmem:[%s773_s0 + $0x50] sm:$0xff]  ;;  %v38_v21 = vld [vmem:[%s773_s0 + $0x58] sm:$0xff]  ;;  %v39_v22 = vld [vmem:[%s773_s0 + $0x60] sm:$0xff] }
   0x7   :  { %543 = vmatpush3.bf16.msra.mxu1 %v609_v1  ;;  %v40_v23 = vld [vmem:[%s773_s0 + $0x68] sm:$0xff]  ;;  %v48_v24 = vpack.c.bf16 %v38_v21, %v37_v20  ;;  %v41_v26 = vld [vmem:[%s773_s0 + $0x70] sm:$0xff]  ;;  %v42_v27 = vld [vmem:[%s773_s0 + $0x78] sm:$0xff] }
   0x8   :  { %560 = vmatprep.subr.bf16.mxu1 %v610_v11  ;;  %v49_v25 = vpack.c.bf16 %v40_v23, %v39_v22  ;;  %v50_v28 = vpack.c.bf16 %v42_v27, %v41_v26  ;;  %v613_v29 = vld [vmem:[%s774_s3 + $0x18] sm:$0xff]   ;;  %v484_v30 = vld [vmem:[%s775_s2] ss:$0 sm:$0xff]  ;;  %v614_v23 = vmov 0.0  }
   0x9   :  { %584 = vmatprep.subr.bf16.mxu0 %v614_v23  ;;  %600 = vmatprep.mubr.msk.bf16.mxu0 %vm615_vm2, %v614_v23  ;;  %v495_v26 = vld [vmem:[%s777_s4] ss:$0 sm:$0xff] }
   0xa   :  { %545 = vmatmul.mubr.msk.bf16.vlgmr.msra.gmra.mrb[0].mxu1 %vm74_vm0, %v44_v9 }
   0xb   :  { %548 = vmatprep.mubr.msk.bf16.mxu1 %vm74_vm0, %v45_v10  ;;  %561 = vmatpush3.bf16.msra.mxu1 %v610_v11 }
   0xc   :  { %562 = vmatprep.subr.bf16.mxu1 %v611_v12 }
   0xf   :  { %563 = vmatpush3.bf16.msra.mxu1 %v611_v12 }
  0x10   :  { %564 = vmatprep.subr.bf16.mxu1 %v612_v17 }
  0x12   :  { %549 = vmatmul.mubr.msk.bf16.gmra.mrb[4].mxu1 %vm74_vm0, %v46_v18 }
  0x13   :  { %552 = vmatprep.mubr.msk.bf16.mxu1 %vm74_vm0, %v47_v19  ;;  %565 = vmatpush3.bf16.msra.mxu1 %v612_v17 }
  0x14   :  { %566 = vmatprep.subr.bf16.mxu1 %v613_v29 }
  0x17   :  { %567 = vmatpush3.bf16.msra.mxu1 %v613_v29 }
  0x1a   :  { %553 = vmatmul.mubr.msk.bf16.gmra.mrb[8].mxu1 %vm74_vm0, %v48_v24  ;;  %v616_v24 = vmov 0  }
  0x1b   :  { %556 = vmatprep.mubr.msk.bf16.mxu1 %vm74_vm0, %v49_v25  ;;  %607 = vset.pattern.permute.xlu0 %v616_v24  ;;  %v406_v25 = vld [vmem:[%s776_s6] sm:$0xff] }
  0x1c   :  { %409 = vperm.xlu0 %607, %v406_v25  }
  0x22   :  { %557 = vmatmul.mubr.msk.bf16.gmra.mrb[12].mxu1 %vm74_vm0, %v50_v28 }
  0xdd   :  { %v546_v31 = vpop.f32.mrb[0].mxu1 }
  0xde   :  { %v142_v32 = vadd.f32 %v546_v31, %v484_v30  ;;  %v133_v33 = vpop.f32.mrb[1].mxu1 }
  0xdf   :  { %v134_v34 = vadd.f32 %v484_v30, %v133_v33  ;;  %v547_v35 = vpop.f32.mrb[2].mxu1 }
  0xe0   :  { %v145_v36 = vadd.f32 %v547_v35, %v484_v30  ;;  %v136_v37 = vpop.f32.mrb[3].mxu1  ;;  %v198_v39 = vmax.f32 %v142_v32, 0.0 }
  0xe1   :  { %v137_v38 = vadd.f32 %v484_v30, %v136_v37  ;;  %v196_v41 = vmax.f32 %v134_v34, 0.0 }
  0xe2   :  { %v199_v40 = vmax.f32 %v145_v36, 0.0 }
  0xe3   :  { %v197_v42 = vmax.f32 %v137_v38, 0.0 }
  0xe4   :  { %v213_v43 = vpack.c.bf16 %v199_v40, %v198_v39 }
  0xe5   :  { %v212_v44 = vpack.c.bf16 %v197_v42, %v196_v41  ;;  %v550_v45 = vpop.f32.mrb[4].mxu1 }
  0xe6   :  { %v158_v46 = vadd.f32 %v550_v45, %v484_v30  ;;  %v149_v47 = vpop.f32.mrb[5].mxu1 }
  0xe7   :  { %v150_v48 = vadd.f32 %v484_v30, %v149_v47  ;;  %568 = vmatprep.mubr.msk.bf16.mxu1 %vm259_vm1, %v212_v44  ;;  %v551_v49 = vpop.f32.mrb[6].mxu1 }
  0xe8   :  { %v202_v50 = vmax.f32 %v158_v46, 0.0  ;;  %v161_v51 = vadd.f32 %v551_v49, %v484_v30  ;;  %569 = vmatmul.mubr.msk.bf16.vlgmr.msra.gmra.mrb[16].mxu1 %vm259_vm1, %v213_v43  ;;  %v152_v52 = vpop.f32.mrb[7].mxu1 }
  0xe9   :  { %v200_v53 = vmax.f32 %v150_v48, 0.0  ;;  %v153_v54 = vadd.f32 %v484_v30, %v152_v52 }
  0xea   :  { %v203_v55 = vmax.f32 %v161_v51, 0.0 }
  0xeb   :  { %v201_v56 = vmax.f32 %v153_v54, 0.0 }
  0xec   :  { %v215_v57 = vpack.c.bf16 %v203_v55, %v202_v50 }
  0xed   :  { %v214_v58 = vpack.c.bf16 %v201_v56, %v200_v53  ;;  %v554_v59 = vpop.f32.mrb[8].mxu1 }
  0xee   :  { %v174_v60 = vadd.f32 %v554_v59, %v484_v30  ;;  %v165_v61 = vpop.f32.mrb[9].mxu1 }
  0xef   :  { %572 = vmatprep.mubr.msk.bf16.mxu1 %vm259_vm1, %v214_v58  ;;  %v166_v62 = vadd.f32 %v484_v30, %v165_v61  ;;  %v555_v63 = vpop.f32.mrb[10].mxu1 }
  0xf0   :  { %573 = vmatmul.mubr.msk.bf16.gmra.mrb[20].mxu1 %vm259_vm1, %v215_v57  ;;  %v206_v0 = vmax.f32 %v174_v60, 0.0  ;;  %v177_v1 = vadd.f32 %v555_v63, %v484_v30  ;;  %v168_v2 = vpop.f32.mrb[11].mxu1 }
  0xf1   :  { %v204_v3 = vmax.f32 %v166_v62, 0.0  ;;  %v169_v4 = vadd.f32 %v484_v30, %v168_v2 }
  0xf2   :  { %v207_v5 = vmax.f32 %v177_v1, 0.0 }
  0xf3   :  { %v205_v6 = vmax.f32 %v169_v4, 0.0 }
  0xf4   :  { %v217_v7 = vpack.c.bf16 %v207_v5, %v206_v0 }
  0xf5   :  { %v216_v8 = vpack.c.bf16 %v205_v6, %v204_v3  ;;  %v558_v9 = vpop.f32.mrb[12].mxu1 }
  0xf6   :  { %v190_v10 = vadd.f32 %v558_v9, %v484_v30  ;;  %v181_v11 = vpop.f32.mrb[13].mxu1 }
  0xf7   :  { %576 = vmatprep.mubr.msk.bf16.mxu1 %vm259_vm1, %v216_v8  ;;  %v182_v12 = vadd.f32 %v484_v30, %v181_v11  ;;  %v559_v13 = vpop.f32.mrb[14].mxu1 }
  0xf8   :  { %577 = vmatmul.mubr.msk.bf16.gmra.mrb[24].mxu1 %vm259_vm1, %v217_v7  ;;  %v210_v14 = vmax.f32 %v190_v10, 0.0  ;;  %v193_v15 = vadd.f32 %v559_v13, %v484_v30  ;;  %v184_v16 = vpop.f32.mrb[15].mxu1 }
  0xf9   :  { %v208_v17 = vmax.f32 %v182_v12, 0.0  ;;  %v185_v18 = vadd.f32 %v484_v30, %v184_v16 }
  0xfa   :  { %v211_v19 = vmax.f32 %v193_v15, 0.0 }
  0xfb   :  { %v209_v20 = vmax.f32 %v185_v18, 0.0 }
  0xfc   :  { %v219_v21 = vpack.c.bf16 %v211_v19, %v210_v14 }
  0xfd   :  { %v218_v22 = vpack.c.bf16 %v209_v20, %v208_v17 }
  0xff   :  { %580 = vmatprep.mubr.msk.bf16.mxu1 %vm259_vm1, %v218_v22 }
 0x100   :  { %581 = vmatmul.mubr.msk.bf16.gmra.mrb[28].mxu1 %vm259_vm1, %v219_v21 }
 0x1bb   :  { %v570_v27 = vpop.f32.mrb[16].mxu1 }
 0x1bc   :  { %v327_v28 = vadd.f32 %v570_v27, %v495_v26  ;;  %v318_v29 = vpop.f32.mrb[17].mxu1 }
 0x1bd   :  { %v319_v30 = vadd.f32 %v495_v26, %v318_v29  ;;  %v571_v31 = vpop.f32.mrb[18].mxu1  ;;  %v410_v29 = vpop.permute.xlu0 %409 }
 0x1be   :  { %v330_v32 = vadd.f32 %v571_v31, %v495_v26  ;;  %v321_v33 = vpop.f32.mrb[19].mxu1  ;;  %v383_v35 = vmax.f32 %v327_v28, 0.0  ;;  %v405_v28 = vld [vmem:[%s778_s5] sm:$0xf] }
 0x1bf   :  { %v322_v34 = vadd.f32 %v495_v26, %v321_v33  ;;  %v381_v37 = vmax.f32 %v319_v30, 0.0 }
 0x1c0   :  { %v384_v36 = vmax.f32 %v330_v32, 0.0 }
 0x1c1   :  { %v382_v38 = vmax.f32 %v322_v34, 0.0 }
 0x1c2   :  { %v398_v39 = vpack.c.bf16 %v384_v36, %v383_v35 }
 0x1c3   :  { %v574_v40 = vpop.f32.mrb[20].mxu1  ;;  %v397_v41 = vpack.c.bf16 %v382_v38, %v381_v37 }
 0x1c4   :  { %v343_v42 = vadd.f32 %v574_v40, %v495_v26  ;;  %v334_v43 = vpop.f32.mrb[21].mxu1  ;;  %v419_v59 = vsel %vm74_vm0, %v398_v39, 0 }
 0x1c5   :  { %v335_v44 = vadd.f32 %v495_v26, %v334_v43  ;;  %v575_v45 = vpop.f32.mrb[22].mxu1  ;;  %v416_v46 = vsel %vm74_vm0, %v397_v41, 0 }
 0x1c6   :  { %v387_v47 = vmax.f32 %v343_v42, 0.0  ;;  %v346_v48 = vadd.f32 %v575_v45, %v495_v26  ;;  %585 = vmatpush3.bf16.xpose.msra.mxu0 %v416_v46  ;;  %v337_v49 = vpop.f32.mrb[23].mxu1 }
 0x1c7   :  { %v385_v50 = vmax.f32 %v335_v44, 0.0  ;;  %v338_v51 = vadd.f32 %v495_v26, %v337_v49  ;;  %586 = vmatprep.subr.bf16.mxu0 %v614_v23 }
 0x1c8   :  { %v388_v52 = vmax.f32 %v346_v48, 0.0 }
 0x1c9   :  { %v386_v53 = vmax.f32 %v338_v51, 0.0 }
 0x1ca   :  { %v400_v54 = vpack.c.bf16 %v388_v52, %v387_v47 }
 0x1cb   :  { %v399_v55 = vpack.c.bf16 %v386_v53, %v385_v50  ;;  %v578_v56 = vpop.f32.mrb[24].mxu1 }
 0x1cc   :  { %v359_v57 = vadd.f32 %v578_v56, %v495_v26  ;;  %v350_v58 = vpop.f32.mrb[25].mxu1  ;;  %v425_v22 = vsel %vm74_vm0, %v400_v54, 0 }
 0x1cd   :  { %v351_v60 = vadd.f32 %v495_v26, %v350_v58  ;;  %v579_v61 = vpop.f32.mrb[26].mxu1  ;;  %v422_v10 = vsel %vm74_vm0, %v399_v55, 0 }
 0x1ce   :  { %587 = vmatpush3.bf16.xpose.msra.mxu0 %v419_v59  ;;  %v391_v62 = vmax.f32 %v359_v57, 0.0  ;;  %v362_v63 = vadd.f32 %v579_v61, %v495_v26  ;;  %v353_v0 = vpop.f32.mrb[27].mxu1 }
 0x1cf   :  { %v389_v1 = vmax.f32 %v351_v60, 0.0  ;;  %588 = vmatprep.subr.bf16.mxu0 %v614_v23  ;;  %v354_v2 = vadd.f32 %v495_v26, %v353_v0 }
 0x1d0   :  { %v392_v3 = vmax.f32 %v362_v63, 0.0 }
 0x1d1   :  { %v390_v4 = vmax.f32 %v354_v2, 0.0 }
 0x1d2   :  { %v402_v5 = vpack.c.bf16 %v392_v3, %v391_v62 }
 0x1d3   :  { %v401_v6 = vpack.c.bf16 %v390_v4, %v389_v1  ;;  %v582_v7 = vpop.f32.mrb[28].mxu1 }
 0x1d4   :  { %v375_v8 = vadd.f32 %v582_v7, %v495_v26  ;;  %v366_v9 = vpop.f32.mrb[29].mxu1  ;;  %v431_v25 = vsel %vm74_vm0, %v402_v5, 0 }
 0x1d5   :  { %v367_v11 = vadd.f32 %v495_v26, %v366_v9  ;;  %v583_v12 = vpop.f32.mrb[30].mxu1  ;;  %v428_v24 = vsel %vm74_vm0, %v401_v6, 0 }
 0x1d6   :  { %589 = vmatpush3.bf16.xpose.msra.mxu0 %v422_v10  ;;  %v395_v13 = vmax.f32 %v375_v8, 0.0  ;;  %v378_v14 = vadd.f32 %v583_v12, %v495_v26  ;;  %v369_v15 = vpop.f32.mrb[31].mxu1 }
 0x1d7   :  { %590 = vmatprep.subr.bf16.mxu0 %v614_v23  ;;  %v393_v16 = vmax.f32 %v367_v11, 0.0  ;;  %v370_v17 = vadd.f32 %v495_v26, %v369_v15 }
 0x1d8   :  { %v396_v18 = vmax.f32 %v378_v14, 0.0 }
 0x1d9   :  { %v394_v19 = vmax.f32 %v370_v17, 0.0 }
 0x1da   :  { %v404_v20 = vpack.c.bf16 %v396_v18, %v395_v13 }
 0x1db   :  { %v403_v21 = vpack.c.bf16 %v394_v19, %v393_v16 }
 0x1dc   :  { %v437_v27 = vsel %vm74_vm0, %v404_v20, 0 }
 0x1dd   :  { %v434_v26 = vsel %vm74_vm0, %v403_v21, 0 }
 0x1de   :  { %591 = vmatpush3.bf16.xpose.msra.mxu0 %v425_v22 }
 0x1df   :  { %592 = vmatprep.subr.bf16.mxu0 %v614_v23 }
 0x1e6   :  { %593 = vmatpush3.bf16.xpose.msra.mxu0 %v428_v24 }
 0x1e7   :  { %594 = vmatprep.subr.bf16.mxu0 %v614_v23 }
 0x1ee   :  { %595 = vmatpush3.bf16.xpose.msra.mxu0 %v431_v25 }
 0x1ef   :  { %596 = vmatprep.subr.bf16.mxu0 %v614_v23 }
 0x1f6   :  { %597 = vmatpush3.bf16.xpose.msra.mxu0 %v434_v26 }
 0x1f7   :  { %598 = vmatprep.subr.bf16.mxu0 %v614_v23 }
 0x1fe   :  { %599 = vmatpush3.bf16.xpose.msra.mxu0 %v437_v27 }
 0x205   :  { %601 = vmatmul.mubr.msk.bf16.vlgmr.msra.gmra.mrb[0].mxu0 %vm74_vm0, %v405_v28 }
 0x2d8   :  { %v473_v30 = vpop.f32.mrb[0].mxu0 }
 0x2d9   :  { %v474_v31 = vadd.f32 %v473_v30, %v410_v29  ;;  %v602_v32 = vpop.f32.mrb[1].mxu0 }
 0x2da   :  { %v476_v33 = vpop.f32.mrb[2].mxu0 }
 0x2db   :  { %479 = vst [vmem:[%s779_s7] sm:$0xff] %v474_v31  ;;  %v603_v34 = vpop.f32.mrb[3].mxu0 }

</bundles_post_ra>
